<compile_context>
chip_gen: v5e
topology: v5e:2x2
jax: 0.10.0
libtpu: 0.0.40
codegen_flags: <defaults>
</compile_context>

<pallas_src>
import jax
import jax.numpy as jnp
from jax.experimental import pallas as pl
from jax.experimental.pallas import tpu as pltpu


# ---------------------------------------------------------------------------
# Kernel
# ---------------------------------------------------------------------------

def _head_matmul_kernel(x_ref, wt_ref, o_ref):
    """x:(tm,K) @ w_t:(K,tn) -> o:(tm,tn). f32 MXU accumulation, single store."""
    o_ref[...] = jnp.dot(
        x_ref[...], wt_ref[...], preferred_element_type=jnp.float32
    ).astype(o_ref.dtype)


# ---------------------------------------------------------------------------
# Tile / VMEM planning
# ---------------------------------------------------------------------------

def _vmem_capacity_bytes() -> int:
    try:
        cap = getattr(pltpu.get_tpu_info(), "vmem_capacity_bytes", None)
        if cap:
            return int(cap)
    except Exception:
        pass
    return 64 * 1024 * 1024  # conservative fallback (v7x per-TensorCore)


def _select_tiles(M, K, N, w_itemsize, out_itemsize):
    """Pick (tm, tn) so the double-buffered plan fits ~75% of physical VMEM."""
    capacity = _vmem_capacity_bytes()
    budget = int(capacity * 0.75)  # headroom for compiler-internal scratch

    tm = M if M <= 256 else 256  # 256 is a multiple of 8/16; cdiv grid masks edges

    def plan_bytes(tm_, tn_):
        # double-buffered x tile + weight slab + output tile
        return 2 * (tm_ * K * w_itemsize + K * tn_ * w_itemsize
                    + tm_ * tn_ * out_itemsize)

    while tm > 8 and plan_bytes(tm, 128) > budget:
        tm = max(8, tm // 2)
    # TODO(synk): split K onto a reduction grid axis (f32 scratch accumulator) if a
    # single (tm, K)+(K, 128) slab still cannot fit VMEM (hidden dims >> 16k).

    if N <= 128:
        tn = N  # full dim -> always a legal block extent
    else:
        n_cap = min(2048, (N // 128) * 128)
        tn = 128
        t = 256
        while t <= n_cap and plan_bytes(tm, t) <= budget:
            tn = t
            t += 128

    plan = plan_bytes(tm, tn)
    vmem_limit = int(min(capacity * 0.85, max(2 * plan, 32 * 1024 * 1024)))
    vmem_limit = int(max(vmem_limit, plan + (1 << 20)))
    return tm, tn, vmem_limit


# ---------------------------------------------------------------------------
# Wrapper: y = x @ W^T with W pre-transposed/pre-cast at init
# ---------------------------------------------------------------------------

def linear_head(x, weight_t, *, out_dtype=None):
    """y = x @ weight_t, where weight_t is the head weight pre-transposed to (K, N)."""
    K, N = weight_t.shape
    *lead, K2 = x.shape
    assert K == K2, f"hidden dim mismatch: x K={K2}, weight K={K}"
    out_dtype = jnp.dtype(out_dtype or x.dtype)

    x2 = x.reshape(-1, K)
    M = x2.shape[0]
    if x2.dtype != weight_t.dtype:
        x2 = x2.astype(weight_t.dtype)  # activations are tiny vs. the weight stream

    w_itemsize = jnp.dtype(weight_t.dtype).itemsize
    out_itemsize = out_dtype.itemsize
    tm, tn, vmem_limit = _select_tiles(M, K, N, w_itemsize, out_itemsize)

    # Vocab axis first: megacore (v7x) splits the dominant weight stream even when
    # M//tm == 1 (decode).  Weight index is constant over the inner token axis, so
    # the weight is DMA'd from HBM exactly once; x (small) is re-streamed per
    # vocab tile only when M exceeds one token tile.
    grid = (pl.cdiv(N, tn), pl.cdiv(M, tm))

    cost = pl.CostEstimate(
        flops=2 * M * N * K,
        transcendentals=0,
        bytes_accessed=K * N * w_itemsize + M * K * w_itemsize + M * N * out_itemsize,
    )

    out = pl.pallas_call(
        _head_matmul_kernel,
        out_shape=jax.ShapeDtypeStruct((M, N), out_dtype),
        grid_spec=pltpu.PrefetchScalarGridSpec(
            num_scalar_prefetch=0,
            grid=grid,
            in_specs=[
                pl.BlockSpec((tm, K), lambda n, m: (m, 0)),
                pl.BlockSpec((K, tn), lambda n, m: (0, n)),
            ],
            out_specs=pl.BlockSpec((tm, tn), lambda n, m: (m, n)),
        ),
        compiler_params=pltpu.CompilerParams(
            dimension_semantics=("parallel", "parallel"),
            vmem_limit_bytes=int(vmem_limit),
        ),
        cost_estimate=cost,
    )(x2, weight_t)

    return out.reshape(tuple(lead) + (N,))


# ---------------------------------------------------------------------------
# Module port
# ---------------------------------------------------------------------------

class TensorParallelHead:
    """JAX/Pallas port of lorax TensorParallelHead (FastLinear, bias=None)."""

    def __init__(self, weight, should_gather: bool, world_size: int = 1,
                 compute_dtype=None):
        # `weight` is the full (N, K) head weight; `compute_dtype` is the dtype the
        # weight is stored and streamed in (bf16 recommended for the lm-head).
        compute_dtype = jnp.dtype(compute_dtype or weight.dtype)
        self.should_gather = should_gather
        self.world_size = world_size

        w = jnp.asarray(weight, dtype=compute_dtype)  # pre-cast ONCE at init
        if should_gather:
            N = w.shape[0]
            assert N % world_size == 0, "vocab must shard evenly across ranks"
            shard = N // world_size
            # Per-"rank" local shard, pre-cast + pre-transposed to (K, shard).
            # On a real TP deployment each device holds only its own shard.
            self.weight_t_shards = [
                jnp.asarray(w[r * shard:(r + 1) * shard].T)
                for r in range(world_size)
            ]
        else:
            self.weight_t = jnp.asarray(w.T)  # (K, N), transposed ONCE at init
        # TODO(synk): int8 (v5e/v6e) / fp8-e4m3 (v7x) weight storage with per-row
        # scales applied after the dot would halve the dominant HBM stream again.

    def forward(self, x):
        if not self.should_gather:
            # super().forward(input) -> FastLinear: x @ W^T
            return linear_head(x, self.weight_t, out_dtype=x.dtype)

        # Tensor-parallel path: each rank computes only its (M, N/world) logits
        # shard (1/world of the weight stream per chip) and the *logits* are
        # gathered.  Single-device simulation: run the per-rank kernel on every
        # shard and concatenate — numerically identical to mm + all_gather + cat.
        # TODO(synk): on real multi-chip TP, keep exactly one shard per device and
        # gather logits with pltpu.make_async_remote_copy (barrier semaphore +
        # CompilerParams(collective_id=...)) overlapped with the vocab-tile loop;
        # never stream the full gathered weight on any device.
        parts = [linear_head(x, wt, out_dtype=x.dtype)
                 for wt in self.weight_t_shards]
        return jnp.concatenate(parts, axis=-1)

    __call__ = forward


# ---------------------------------------------------------------------------
# Demo / correctness check
# ---------------------------------------------------------------------------

if __name__ == "__main__":
    key = jax.random.PRNGKey(0)
    kx, kw = jax.random.split(key)

    M, K, N = 8, 128, 256  # tokens, hidden, vocab
    x = jax.random.normal(kx, (M, K), dtype=jnp.float32)
    w_full = jax.random.normal(kw, (N, K), dtype=jnp.float32) * 0.02
    ref = x @ w_full.T

    # 1) no gather, f32 weight stream.
    head = TensorParallelHead(w_full, should_gather=False)
    y1 = jax.block_until_ready(head.forward(x))
    assert y1.shape == (M, N) and y1.dtype == jnp.float32
    assert jnp.allclose(y1, ref, atol=1e-4, rtol=1e-4)

    # 2) gather path (world_size=2; single-device simulation of mm + all_gather + cat).
    head_tp = TensorParallelHead(w_full, should_gather=True, world_size=2)
    y2 = jax.block_until_ready(head_tp.forward(x))
    assert y2.shape == (M, N)
    assert jnp.allclose(y2, ref, atol=1e-4, rtol=1e-4)

    # 3) bf16 weight streaming (weight pre-cast once at init), bf16 activations/output.
    head_bf16 = TensorParallelHead(w_full, should_gather=False,
                                   compute_dtype=jnp.bfloat16)
    y3 = jax.block_until_ready(head_bf16.forward(x.astype(jnp.bfloat16)))
    assert y3.shape == (M, N) and y3.dtype == jnp.bfloat16
    assert jnp.allclose(y3.astype(jnp.float32), ref, atol=5e-2, rtol=5e-2)

    # 4) decode-shaped call (M=1) exercises the (1, K) full-row block path.
    y4 = jax.block_until_ready(head.forward(x[:1]))
    assert y4.shape == (1, N)
    assert jnp.allclose(y4, ref[:1], atol=1e-4, rtol=1e-4)

    # 5) vocab not a multiple of the vocab tile: pl.cdiv grid + edge-masked block.
    N_rag = 320
    w_rag = jax.random.normal(kw, (N_rag, K), dtype=jnp.float32) * 0.02
    head_rag = TensorParallelHead(w_rag, should_gather=False)
    y5 = jax.block_until_ready(head_rag.forward(x))
    assert y5.shape == (M, N_rag)
    assert jnp.allclose(y5, x @ w_rag.T, atol=1e-4, rtol=1e-4)

    print("KERNEL_OK")
</pallas_src>

<mosaic_0001>
module attributes {stable_mosaic.version = 11 : i64} {
  func.func @_head_matmul_kernel(%arg0: i32, %arg1: i32, %arg2: memref<8x128xf32, #tpu.memory_space<vmem>>, %arg3: memref<128x256xf32, #tpu.memory_space<vmem>>, %arg4: memref<8x256xf32, #tpu.memory_space<vmem>>) attributes {dimension_semantics = [#tpu.dimension_semantics<parallel>, #tpu.dimension_semantics<parallel>], iteration_bounds = array<i64: 1, 1>, scalar_prefetch = 0 : i64, scratch_operands = 0 : i64, tpu.core_type = #tpu.core_type<tc>, window_params = [{transform_indices = @transform_0, window_bounds = array<i64: 8, 128>}, {transform_indices = @transform_1, window_bounds = array<i64: 128, 256>}, {transform_indices = @transform_2, window_bounds = array<i64: 8, 256>}]} {
    %c0 = arith.constant 0 : index
    %c0_0 = arith.constant 0 : index
    %0 = vector.load %arg2[%c0, %c0_0] : memref<8x128xf32, #tpu.memory_space<vmem>>, vector<8x128xf32>
    %c0_1 = arith.constant 0 : index
    %c0_2 = arith.constant 0 : index
    %1 = vector.load %arg3[%c0_1, %c0_2] : memref<128x256xf32, #tpu.memory_space<vmem>>, vector<128x256xf32>
    %cst = arith.constant dense<0.000000e+00> : vector<8x256xf32>
    %2 = tpu.matmul %0, %1, %cst {dimension_numbers = #tpu.dot_dimension_numbers<[1], [0], [0], [1], [0, 0, 1, 1], [], []>} : vector<8x128xf32>, vector<128x256xf32>, vector<8x256xf32> -> vector<8x256xf32>
    %c0_3 = arith.constant 0 : index
    %c0_4 = arith.constant 0 : index
    %3 = vector.load %arg4[%c0_3, %c0_4] : memref<8x256xf32, #tpu.memory_space<vmem>>, vector<8x256xf32>
    tpu.vector_store %arg4[%c0_3, %c0_4], %2 {strides = array<i32>} : memref<8x256xf32, #tpu.memory_space<vmem>>, vector<8x256xf32>,
    return
  }
  func.func @transform_0(%arg0: i32, %arg1: i32) -> (i32, i32) {
    %c0_i32 = arith.constant 0 : i32
    %c0_i32_0 = arith.constant 0 : i32
    return %arg1, %c0_i32 : i32, i32
  }
  func.func @transform_1(%arg0: i32, %arg1: i32) -> (i32, i32) {
    %c0_i32 = arith.constant 0 : i32
    %c0_i32_0 = arith.constant 0 : i32
    return %c0_i32, %arg0 : i32, i32
  }
  func.func @transform_2(%arg0: i32, %arg1: i32) -> (i32, i32) {
    %c0_i32 = arith.constant 0 : i32
    return %arg1, %arg0 : i32, i32
  }
}

</mosaic_0001>

<bundles_post_ra>
// kernel: tpu_custom_call.1
= control target key start
LH: loop header
LB: loop body
LE: loop exit
PB: predicated region body
PF: predicated region fallthrough
CT: control target
= control target key end

     0   :  { %7 = vsyncpa [#allocation3], 0  ;;  %s247_s0 = inlined_call_operand.hbm [shape: f32[8,128], index: 0, kind: input, shape index: {}]   ;;  %s248_s1 = inlined_call_operand.hbm [shape: f32[128,256], index: 1, kind: input, shape index: {}]   ;;  %s249_s2 = inlined_call_operand.hbm [shape: f32[8,256], index: 2, kind: output, shape index: {}]  }
   0x1   :  { %8 = vsyncpa [#allocation6], 0 }
   0x2   :  { %9 = vsyncpa [#allocation4], 0  ;;  %s15_s11 = sshll.u32 %s247_s0, 4  ;;  %s218_s12 = smov [#allocation2]   ;;  %s16_s11 = int_to_ptr.hbm [resolvable:$true] %s15_s11 }
   0x3   :  { %s17_s13 = sshll.u32 %s218_s12, 4  ;;  %s25_s16 = sshll.u32 %s248_s1, 4  ;;  %s18_s13 = int_to_ptr.vmem [resolvable:$true] %s17_s13  ;;  %s26_s16 = int_to_ptr.hbm [resolvable:$true] %s25_s16 }
   0x4   :  { %20 = dma.hbm_to_vmem [thread:$0]  %s16_s11, 128, %s18_s13, [#allocation3]  }
   0x5   :  { %s219_s17 = smov [#allocation5]   ;;  %s220_s19 = smov 256  }
   0x6   :  { %s27_s18 = sshll.u32 %s219_s17, 4  ;;  %s221_s20 = smov 16   ;;  %s28_s18 = int_to_ptr.vmem [resolvable:$true] %s27_s18 }
   0x7   :  { %33 = dma.hbm_to_vmem [thread:$0]  %s26_s16, 4096, %s28_s18, [#allocation6], %s220_s19, %s220_s19, %s221_s20  }
   0x8   :  { %212 = dma.done.wait [#allocation3], 128  }
   0x9   :  { %213 = vsyncadd [#allocation3], 4294967168 }
   0xa   :  { %214 = dma.done.wait [#allocation6], 4096  }
   0xb   :  { %215 = vsyncadd [#allocation6], 4294963200  ;;  %v73_v0 = vld [vmem:[#allocation5 + $0xf0] sm:$0xff]  ;;  %v74_v1 = vld [vmem:[#allocation5 + $0xf8] sm:$0xff]  ;;  %s222_s0 = smov [#allocation7]   ;;  %s124_s23 = sshll.u32 %s249_s2, 4  ;;  %s125_s23 = int_to_ptr.hbm [resolvable:$true] %s124_s23 }
   0xc   :  { %v71_v2 = vld [vmem:[#allocation5 + $0xe0] sm:$0xff]  ;;  %75 = vmatpush.msra.mxu0 %v73_v0  ;;  %95 = vmatpush.msra.mxu1 %v74_v1  ;;  %v72_v3 = vld [vmem:[#allocation5 + $0xe8] sm:$0xff]  ;;  %v69_v4 = vld [vmem:[#allocation5 + $0xd0] sm:$0xff]  ;;  %s122_s1 = sshll.u32 %s222_s0, 4  ;;  %s123_s1 = int_to_ptr.vmem [resolvable:$true] %s122_s1 }
   0xd   :  { %v70_v5 = vld [vmem:[#allocation5 + $0xd8] sm:$0xff]  ;;  %v67_v6 = vld [vmem:[#allocation5 + $0xc0] sm:$0xff]  ;;  %v68_v7 = vld [vmem:[#allocation5 + $0xc8] sm:$0xff] }
   0xe   :  { %76 = vmatpush.msra.mxu0 %v71_v2  ;;  %96 = vmatpush.msra.mxu1 %v72_v3  ;;  %v65_v8 = vld [vmem:[#allocation5 + $0xb0] sm:$0xff]  ;;  %v66_v9 = vld [vmem:[#allocation5 + $0xb8] sm:$0xff]  ;;  %v63_v10 = vld [vmem:[#allocation5 + $0xa0] sm:$0xff] }
   0xf   :  { %v64_v11 = vld [vmem:[#allocation5 + $0xa8] sm:$0xff]  ;;  %v61_v12 = vld [vmem:[#allocation5 + $0x90] sm:$0xff]  ;;  %v62_v13 = vld [vmem:[#allocation5 + $0x98] sm:$0xff] }
  0x10   :  { %77 = vmatpush.msra.mxu0 %v69_v4  ;;  %97 = vmatpush.msra.mxu1 %v70_v5  ;;  %v59_v14 = vld [vmem:[#allocation5 + $0x80] sm:$0xff]  ;;  %v60_v15 = vld [vmem:[#allocation5 + $0x88] sm:$0xff]  ;;  %v57_v16 = vld [vmem:[#allocation5 + $0x70] sm:$0xff] }
  0x11   :  { %v58_v17 = vld [vmem:[#allocation5 + $0x78] sm:$0xff]  ;;  %v55_v18 = vld [vmem:[#allocation5 + $0x60] sm:$0xff]  ;;  %v56_v19 = vld [vmem:[#allocation5 + $0x68] sm:$0xff] }
  0x12   :  { %78 = vmatpush.msra.mxu0 %v67_v6  ;;  %98 = vmatpush.msra.mxu1 %v68_v7  ;;  %v53_v20 = vld [vmem:[#allocation5 + $0x50] sm:$0xff]  ;;  %v54_v21 = vld [vmem:[#allocation5 + $0x58] sm:$0xff]  ;;  %v51_v22 = vld [vmem:[#allocation5 + $0x40] sm:$0xff] }
  0x13   :  { %v52_v23 = vld [vmem:[#allocation5 + $0x48] sm:$0xff]  ;;  %v49_v24 = vld [vmem:[#allocation5 + $0x30] sm:$0xff]  ;;  %v50_v25 = vld [vmem:[#allocation5 + $0x38] sm:$0xff] }
  0x14   :  { %79 = vmatpush.msra.mxu0 %v65_v8  ;;  %99 = vmatpush.msra.mxu1 %v66_v9  ;;  %v47_v26 = vld [vmem:[#allocation5 + $0x20] sm:$0xff]  ;;  %v48_v27 = vld [vmem:[#allocation5 + $0x28] sm:$0xff]  ;;  %v45_v28 = vld [vmem:[#allocation5 + $0x10] sm:$0xff] }
  0x15   :  { %v46_v29 = vld [vmem:[#allocation5 + $0x18] sm:$0xff]  ;;  %v43_v30 = vld [vmem:[#allocation5] sm:$0xff]  ;;  %v44_v31 = vld [vmem:[#allocation5 + $0x8] sm:$0xff] }
  0x16   :  { %80 = vmatpush.msra.mxu0 %v63_v10  ;;  %100 = vmatpush.msra.mxu1 %v64_v11  ;;  %v42_v32 = vld [vmem:[#allocation2] sm:$0xff] }
  0x18   :  { %81 = vmatpush.msra.mxu0 %v61_v12  ;;  %101 = vmatpush.msra.mxu1 %v62_v13 }
  0x1a   :  { %82 = vmatpush.msra.mxu0 %v59_v14  ;;  %102 = vmatpush.msra.mxu1 %v60_v15 }
  0x1c   :  { %83 = vmatpush.msra.mxu0 %v57_v16  ;;  %103 = vmatpush.msra.mxu1 %v58_v17 }
  0x1e   :  { %84 = vmatpush.msra.mxu0 %v55_v18  ;;  %104 = vmatpush.msra.mxu1 %v56_v19 }
  0x20   :  { %85 = vmatpush.msra.mxu0 %v53_v20  ;;  %105 = vmatpush.msra.mxu1 %v54_v21 }
  0x22   :  { %86 = vmatpush.msra.mxu0 %v51_v22  ;;  %106 = vmatpush.msra.mxu1 %v52_v23 }
  0x24   :  { %87 = vmatpush.msra.mxu0 %v49_v24  ;;  %107 = vmatpush.msra.mxu1 %v50_v25 }
  0x26   :  { %88 = vmatpush.msra.mxu0 %v47_v26  ;;  %108 = vmatpush.msra.mxu1 %v48_v27 }
  0x28   :  { %89 = vmatpush.msra.mxu0 %v45_v28  ;;  %109 = vmatpush.msra.mxu1 %v46_v29 }
  0x2a   :  { %90 = vmatpush.msra.mxu0 %v43_v30  ;;  %110 = vmatpush.msra.mxu1 %v44_v31 }
  0x2b   :  { %91 = vmatmul.f32.vlgmr.msra.gmra.mxu0 %v42_v32  ;;  %111 = vmatmul.f32.vlgmr.msra.gmra.mxu1 %v42_v32 }
  0xa8   :  { %v92_v33 = vpop.f32.mrf.mxu0  ;;  %v112_v34 = vpop.f32.mrf.mxu1 }
  0xa9   :  { %115 = vst [vmem:[#allocation7] sm:$0xff] %v92_v33 }
  0xaa   :  { %116 = vst [vmem:[#allocation7 + $0x8] sm:$0xff] %v112_v34 }
  0xab   :  { %127 = dma.vmem_to_hbm [thread:$0]  %s123_s1, 256, %s125_s23, [#allocation4]  }
  0xac   :  { %216 = dma.done.wait [#allocation4], 256  }
  0xad   :  { %217 = vsyncadd [#allocation4], 4294967040 }
  0xae   :  { %132 = vsyncpa [#allocation3], 1 }
  0xaf   :  { %133 = vsyncpa [#allocation6], 1 }
  0xb0   :  { %134 = vsyncpa [#allocation4], 1 }

</bundles_post_ra>
